<compile_context>
chip_gen: v5e
topology: v5e:2x2
jax: 0.10.0
libtpu: 0.0.40
codegen_flags: <defaults>
</compile_context>

<pallas_src>
import functools

import jax
import jax.numpy as jnp
from jax.experimental import pallas as pl
from jax.experimental.pallas import tpu as pltpu

_MIB = 1024 * 1024


# ----------------------------------------------------------------------------
# Tile / VMEM sizing
# ----------------------------------------------------------------------------
def _round_up(x: int, m: int) -> int:
    return ((x + m - 1) // m) * m


def _pick_tile(extent: int, candidates) -> int:
    for c in candidates:
        if extent >= c and extent % c == 0:
            return c
    return extent


def _vmem_capacity_bytes() -> int:
    """Best-effort physical VMEM capacity of the local TPU generation."""
    try:
        return int(pltpu.get_tpu_info().vmem_capacity_bytes)
    except Exception:
        pass
    try:
        kind = jax.devices()[0].device_kind.lower()
        if any(tag in kind for tag in ("v4", "v5", "v6")):
            return 128 * _MIB
    except Exception:
        pass
    return 64 * _MIB  # conservative default (v7x physical VMEM per TC)


def _choose_tiles(R: int, H: int, out_itemsize: int):
    """Pick (tm, tk, vmem_limit_bytes) so the working set fits this chip's VMEM.

    Arithmetic intensity of the fused kernel is ~tm FLOPs per weight byte, so
    tm is pushed as high as the VMEM budget allows (128 MiB parts → tm up to
    1024; 64 MiB parts → 256–512), subject to leaving ≥2 row tiles for the
    megacore-parallel row axis when R is large.
    """
    cap = _vmem_capacity_bytes()
    vmem_limit = max(32 * _MIB, min(cap - 16 * _MIB, 96 * _MIB))
    budget = vmem_limit - 4 * _MIB  # headroom for compiler-internal scratch

    # Contraction-chunk size tk (must divide H).
    if H % 128 != 0:
        # TODO(synk): pad H (and the weight stack) to a multiple of 128 for
        #             lane-dense tiles when the hidden size is not 128-aligned.
        tk = H
    elif H <= 2048:
        tk = H  # whole-layer weight block; drops the K grid axis entirely
    else:
        tk = _pick_tile(H, (512, 256, 128)) if cap >= 96 * _MIB else _pick_tile(H, (256, 128))

    def working_set(tm: int) -> int:
        return (
            2 * tm * H * 2                 # input slab block (bf16), double-buffered
            + 2 * tm * H * out_itemsize    # output block, double-buffered
            + 2 * tk * H * 2               # weight chunk (bf16), double-buffered
            + 2 * H * 4                    # bias block
            + tm * H * 2                   # resident bf16 activation scratch
            + (tm * H * 4 if tk != H else 0)  # f32 accumulator (multi-K path only)
        )

    tm = 8
    for c in (1024, 512, 256, 128, 64, 32, 16, 8):
        if working_set(c) <= budget:
            tm = c
            break
    tm = min(tm, _round_up(R, 8))

    # Megacore: if one giant tile would cover all rows, split so both
    # TensorCores get work (only when R is large enough that AI stays high).
    if R > 256 and -(-R // tm) == 1:
        tm = max(256, _round_up(-(-R // 2), 8))

    return tm, tk, int(vmem_limit)


# ----------------------------------------------------------------------------
# Kernels
# ----------------------------------------------------------------------------
def _fused_layers_kernel_wide(x_ref, w_ref, b_ref, o_ref, act_ref):
    """nk == 1 path: whole-layer weight block, no K reduction axis.

    Refs (per grid step (i, l)):
      x_ref   [tm, H] bf16   input row tile (resident across layers)
      w_ref   [H, H]  bf16   layer-l weights
      b_ref   [1, H]  f32    layer-l bias
      o_ref   [tm, H]        output row tile (written on the last layer only)
      act_ref [tm, H] bf16   resident activation scratch
    """
    l = pl.program_id(1)
    nl = pl.num_programs(1)

    @pl.when(l == 0)
    def _():
        act_ref[...] = x_ref[...].astype(act_ref.dtype)

    y = jnp.dot(act_ref[...], w_ref[...], preferred_element_type=jnp.float32)
    y = jax.nn.gelu(y + b_ref[...].astype(jnp.float32), approximate=True)

    @pl.when(l != nl - 1)
    def _():
        act_ref[...] = y.astype(act_ref.dtype)

    @pl.when(l == nl - 1)
    def _():
        o_ref[...] = y.astype(o_ref.dtype)


def _fused_layers_kernel_chunked(x_ref, w_ref, b_ref, o_ref, act_ref, acc_ref, *, tk, nk):
    """nk > 1 path: K-chunked reduction with a resident, K-chunked activation.

    Refs (per grid step (i, l, k)):
      x_ref   [tm, H]          bf16  input row tile (resident across layers/K)
      w_ref   [tk, H]          bf16  layer-l weight K-chunk (streamed, pipelined)
      b_ref   [1, H]           f32   layer-l bias
      o_ref   [tm, H]                output row tile (last layer only)
      act_ref [nk, tm, tk]     bf16  resident activation, chunked along K
      acc_ref [tm, H]          f32   matmul accumulator
    """
    l = pl.program_id(1)
    k = pl.program_id(2)
    nl = pl.num_programs(1)

    # Stage the input slab chunk-wise into the resident bf16 activation
    # (once per row tile; chunk-wise avoids a full-width [tm,H] temporary).
    @pl.when((l == 0) & (k == 0))
    def _():
        for kk in range(nk):
            act_ref[kk] = x_ref[:, kk * tk:(kk + 1) * tk].astype(act_ref.dtype)

    # MXU: bf16 operands, f32 accumulation.  Accumulator init is fused into
    # the first K step (no separate zero fill).
    psum = jnp.dot(act_ref[k], w_ref[...], preferred_element_type=jnp.float32)

    @pl.when(k == 0)
    def _():
        acc_ref[...] = psum

    @pl.when(k != 0)
    def _():
        acc_ref[...] += psum

    # Layer finalize (NOT on the last layer): bias + GELU in f32, chunk-wise,
    # requantized to bf16 as the next layer's resident input.
    @pl.when((k == nk - 1) & (l != nl - 1))
    def _():
        for kk in range(nk):
            ych = acc_ref[:, kk * tk:(kk + 1) * tk] + \
                  b_ref[:, kk * tk:(kk + 1) * tk].astype(jnp.float32)
            act_ref[kk] = jax.nn.gelu(ych, approximate=True).astype(act_ref.dtype)

    # Last layer, last K step: output epilogue only (GELU computed once).
    @pl.when((k == nk - 1) & (l == nl - 1))
    def _():
        y = acc_ref[...] + b_ref[...].astype(jnp.float32)
        o_ref[...] = jax.nn.gelu(y, approximate=True).astype(o_ref.dtype)


# ----------------------------------------------------------------------------
# Wrapper
# ----------------------------------------------------------------------------
def _fused_alicepp_forward(x, w_stack, b_stack, *, out_dtype, tk_override=None):
    """x: [R, H] bf16; w_stack: [L, H, H] bf16; b_stack: [L, 1, H] f32."""
    R, H = x.shape
    nl = int(w_stack.shape[0])
    if nl == 0:
        return x.astype(out_dtype)

    tm, tk, vmem_limit = _choose_tiles(R, H, jnp.dtype(out_dtype).itemsize)
    if tk_override is not None and H % tk_override == 0:
        tk = tk_override
    nk = H // tk

    # Pad rows to a tile multiple (garbage rows are dropped on return).
    n_tiles = -(-R // tm)
    r_pad = n_tiles * tm
    if r_pad != R:
        x = jnp.pad(x, ((0, r_pad - R), (0, 0)))

    # TODO(synk): for very large R (prefill), a layer-major / row-super-tile
    #             loop order cuts total weight HBM traffic several-fold.
    cparams = pltpu.CompilerParams(
        # Row tiles are independent → megacore-parallel; layer / K axes carry
        # resident VMEM state → arbitrary.
        dimension_semantics=(("parallel", "arbitrary") if nk == 1
                             else ("parallel", "arbitrary", "arbitrary")),
        vmem_limit_bytes=vmem_limit,
    )

    if nk == 1:
        out = pl.pallas_call(
            _fused_layers_kernel_wide,
            out_shape=jax.ShapeDtypeStruct((r_pad, H), out_dtype),
            grid_spec=pltpu.PrefetchScalarGridSpec(
                num_scalar_prefetch=0,
                grid=(n_tiles, nl),
                in_specs=[
                    pl.BlockSpec((tm, H), lambda i, l: (i, 0)),
                    pl.BlockSpec((None, H, H), lambda i, l: (l, 0, 0)),
                    pl.BlockSpec((None, 1, H), lambda i, l: (l, 0, 0)),
                ],
                out_specs=pl.BlockSpec((tm, H), lambda i, l: (i, 0)),
                scratch_shapes=[pltpu.VMEM((tm, H), jnp.bfloat16)],
            ),
            compiler_params=cparams,
        )(x, w_stack, b_stack)
    else:
        kernel = functools.partial(_fused_layers_kernel_chunked, tk=tk, nk=nk)
        out = pl.pallas_call(
            kernel,
            out_shape=jax.ShapeDtypeStruct((r_pad, H), out_dtype),
            grid_spec=pltpu.PrefetchScalarGridSpec(
                num_scalar_prefetch=0,
                grid=(n_tiles, nl, nk),
                in_specs=[
                    # Input row tile: resident across (layer, k).
                    pl.BlockSpec((tm, H), lambda i, l, k: (i, 0)),
                    # Weight K-chunk of layer l: streamed & double-buffered.
                    # TODO(synk): try pipeline_mode=pl.Buffered(3) once the
                    #             kernel is MXU-bound (hides layer-boundary bubble).
                    pl.BlockSpec((None, tk, H), lambda i, l, k: (l, k, 0)),
                    # Bias of layer l.
                    pl.BlockSpec((None, 1, H), lambda i, l, k: (l, 0, 0)),
                ],
                out_specs=pl.BlockSpec((tm, H), lambda i, l, k: (i, 0)),
                scratch_shapes=[
                    pltpu.VMEM((nk, tm, tk), jnp.bfloat16),  # resident activations
                    pltpu.VMEM((tm, H), jnp.float32),        # f32 accumulator
                ],
            ),
            compiler_params=cparams,
        )(x, w_stack, b_stack)

    return out[:R] if r_pad != R else out


class ALICEPPModulePallas:
    """JAX/Pallas realization of the ALICEPPModule interface.

    forward(hidden, *, start_layer) runs layers[start_layer:] on `hidden`
    (h <- gelu(h @ W_l + b_l)) and returns the final hidden state with the
    same shape/dtype as the input.
    """

    def __init__(self, hidden_dim: int, num_layers: int, param_dtype=jnp.bfloat16):
        self.hidden_dim = hidden_dim
        self.num_layers = num_layers
        # Deterministic synthetic parameters (no checkpoint loading).
        key = jax.random.PRNGKey(42)
        ws, bs = [], []
        scale = 1.0 / jnp.sqrt(jnp.float32(hidden_dim))
        for _ in range(num_layers):
            kw, kb, key = jax.random.split(key, 3)
            ws.append(jax.random.normal(kw, (hidden_dim, hidden_dim), jnp.float32) * scale)
            bs.append(jax.random.normal(kb, (1, hidden_dim), jnp.float32) * 0.01)
        # Weights bf16 (MXU operands, halves HBM weight stream); biases f32.
        # TODO(synk): optional int8 weight path (per-channel scales folded into
        #             the f32 epilogue) for v5e's integer MXU.
        self.w_stack = jnp.stack(ws).astype(param_dtype)     # [L, H, H]
        self.b_stack = jnp.stack(bs).astype(jnp.float32)     # [L, 1, H]

    def forward(self, hidden: jax.Array, *, start_layer: int, _tk_override=None) -> jax.Array:
        B, S, H = hidden.shape
        assert H == self.hidden_dim
        assert 0 <= start_layer <= self.num_layers
        if start_layer == self.num_layers:
            return hidden
        # bf16 input slab: the kernel quantizes activations to bf16 anyway, so
        # this halves the input DMA with identical numerics.
        x = hidden.reshape(B * S, H).astype(jnp.bfloat16)
        out = _fused_alicepp_forward(
            x, self.w_stack[start_layer:], self.b_stack[start_layer:],
            out_dtype=hidden.dtype, tk_override=_tk_override)
        return out.reshape(B, S, H)

    __call__ = forward


def _reference_forward(module, hidden, *, start_layer):
    """Pure-JAX reference mirroring the kernel's bf16/f32 mixed precision."""
    B, S, H = hidden.shape
    x = hidden.reshape(B * S, H).astype(jnp.float32)
    for l in range(start_layer, module.num_layers):
        xb = x.astype(jnp.bfloat16)
        y = jnp.dot(xb, module.w_stack[l], preferred_element_type=jnp.float32)
        y = y + module.b_stack[l]
        x = jax.nn.gelu(y, approximate=True)
    return x.astype(hidden.dtype).reshape(B, S, H)


if __name__ == "__main__":
    # --- Test 1: H <= 2048 fast path (nk == 1), lane-dense shapes. ---
    B, S, H = 2, 8, 128
    NUM_LAYERS = 4
    START_LAYER = 1

    hidden = jax.random.normal(jax.random.PRNGKey(0), (B, S, H), jnp.float32)
    module = ALICEPPModulePallas(hidden_dim=H, num_layers=NUM_LAYERS)

    out = jax.block_until_ready(module(hidden, start_layer=START_LAYER))
    ref = _reference_forward(module, hidden, start_layer=START_LAYER)

    assert out.shape == (B, S, H), out.shape
    assert out.dtype == hidden.dtype, out.dtype
    err1 = float(jnp.max(jnp.abs(out.astype(jnp.float32) - ref.astype(jnp.float32))))
    assert jnp.allclose(out, ref, atol=2e-2, rtol=2e-2), err1

    # --- Test 2: multi-K path (tk < H) + non-multiple-of-8 row count (padding). ---
    B2, S2, H2 = 1, 5, 256
    module2 = ALICEPPModulePallas(hidden_dim=H2, num_layers=3)
    hidden2 = jax.random.normal(jax.random.PRNGKey(1), (B2, S2, H2), jnp.float32)

    out2 = jax.block_until_ready(module2(hidden2, start_layer=0, _tk_override=128))
    ref2 = _reference_forward(module2, hidden2, start_layer=0)

    assert out2.shape == (B2, S2, H2), out2.shape
    assert out2.dtype == hidden2.dtype, out2.dtype
    err2 = float(jnp.max(jnp.abs(out2.astype(jnp.float32) - ref2.astype(jnp.float32))))
    assert jnp.allclose(out2, ref2, atol=2e-2, rtol=2e-2), err2

    print("KERNEL_OK")
</pallas_src>

<mosaic_0001>
module attributes {stable_mosaic.version = 11 : i64} {
  func.func @_fused_layers_kernel_wide(%arg0: i32, %arg1: i32, %arg2: memref<16x128xbf16, #tpu.memory_space<vmem>>, %arg3: memref<1x128x128xbf16, #tpu.memory_space<vmem>>, %arg4: memref<1x1x128xf32, #tpu.memory_space<vmem>>, %arg5: memref<16x128xf32, #tpu.memory_space<vmem>>, %arg6: memref<16x128xbf16, #tpu.memory_space<vmem>>) attributes {dimension_semantics = [#tpu.dimension_semantics<parallel>, #tpu.dimension_semantics<arbitrary>], iteration_bounds = array<i64: 1, 3>, scalar_prefetch = 0 : i64, scratch_operands = 1 : i64, tpu.core_type = #tpu.core_type<tc>, window_params = [{transform_indices = @transform_0, window_bounds = array<i64: 16, 128>}, {transform_indices = @transform_1, window_bounds = array<i64: 1, 128, 128>}, {transform_indices = @transform_2, window_bounds = array<i64: 1, 1, 128>}, {transform_indices = @transform_3, window_bounds = array<i64: 16, 128>}]} {
    %c0_i32 = arith.constant 0 : i32
    %0 = arith.cmpi eq, %arg1, %c0_i32 : i32
    %1 = arith.extui %0 : i1 to i32
    %c0_i32_0 = arith.constant 0 : i32
    %2 = arith.cmpi ne, %1, %c0_i32_0 : i32
    scf.if %2 {
      %c0_15 = arith.constant 0 : index
      %c0_16 = arith.constant 0 : index
      %30 = vector.load %arg2[%c0_15, %c0_16] : memref<16x128xbf16, #tpu.memory_space<vmem>>, vector<16x128xbf16>
      %c0_17 = arith.constant 0 : index
      %c0_18 = arith.constant 0 : index
      %31 = vector.load %arg6[%c0_17, %c0_18] : memref<16x128xbf16, #tpu.memory_space<vmem>>, vector<16x128xbf16>
      tpu.vector_store %arg6[%c0_17, %c0_18], %30 {strides = array<i32>} : memref<16x128xbf16, #tpu.memory_space<vmem>>, vector<16x128xbf16>,
    } else {
    }
    %c0 = arith.constant 0 : index
    %c0_1 = arith.constant 0 : index
    %3 = vector.load %arg6[%c0, %c0_1] : memref<16x128xbf16, #tpu.memory_space<vmem>>, vector<16x128xbf16>
    %c0_2 = arith.constant 0 : index
    %c0_3 = arith.constant 0 : index
    %c0_4 = arith.constant 0 : index
    %4 = vector.load %arg3[%c0_2, %c0_3, %c0_4] : memref<1x128x128xbf16, #tpu.memory_space<vmem>>, vector<1x128x128xbf16>
    %5 = vector.shape_cast %4 : vector<1x128x128xbf16> to vector<128x128xbf16>
    %cst = arith.constant dense<0.000000e+00> : vector<16x128xf32>
    %6 = tpu.matmul %3, %5, %cst {dimension_numbers = #tpu.dot_dimension_numbers<[1], [0], [0], [1], [0, 0, 1, 1], [], []>} : vector<16x128xbf16>, vector<128x128xbf16>, vector<16x128xf32> -> vector<16x128xf32>
    %c0_5 = arith.constant 0 : index
    %c0_6 = arith.constant 0 : index
    %c0_7 = arith.constant 0 : index
    %7 = vector.load %arg4[%c0_5, %c0_6, %c0_7] : memref<1x1x128xf32, #tpu.memory_space<vmem>>, vector<1x1x128xf32>
    %8 = vector.shape_cast %7 : vector<1x1x128xf32> to vector<1x128xf32>
    %9 = vector.broadcast %8 : vector<1x128xf32> to vector<16x128xf32>
    %10 = arith.addf %6, %9 : vector<16x128xf32>
    %11 = arith.mulf %10, %10 : vector<16x128xf32>
    %12 = arith.mulf %10, %11 : vector<16x128xf32>
    %cst_8 = arith.constant 4.471500e-02 : f32
    %13 = vector.broadcast %cst_8 : f32 to vector<16x128xf32>
    %14 = arith.mulf %13, %12 : vector<16x128xf32>
    %15 = arith.addf %10, %14 : vector<16x128xf32>
    %cst_9 = arith.constant 0.797884583 : f32
    %16 = vector.broadcast %cst_9 : f32 to vector<16x128xf32>
    %17 = arith.mulf %16, %15 : vector<16x128xf32>
    %18 = math.tanh %17 : vector<16x128xf32>
    %cst_10 = arith.constant 1.000000e+00 : f32
    %19 = vector.broadcast %cst_10 : f32 to vector<16x128xf32>
    %20 = arith.addf %19, %18 : vector<16x128xf32>
    %cst_11 = arith.constant 5.000000e-01 : f32
    %21 = vector.broadcast %cst_11 : f32 to vector<16x128xf32>
    %22 = arith.mulf %21, %20 : vector<16x128xf32>
    %23 = arith.mulf %10, %22 : vector<16x128xf32>
    %c2_i32 = arith.constant 2 : i32
    %24 = arith.cmpi ne, %arg1, %c2_i32 : i32
    %25 = arith.extui %24 : i1 to i32
    %c0_i32_12 = arith.constant 0 : i32
    %26 = arith.cmpi ne, %25, %c0_i32_12 : i32
    scf.if %26 {
      %30 = arith.truncf %23 : vector<16x128xf32> to vector<16x128xbf16>
      %c0_15 = arith.constant 0 : index
      %c0_16 = arith.constant 0 : index
      %31 = vector.load %arg6[%c0_15, %c0_16] : memref<16x128xbf16, #tpu.memory_space<vmem>>, vector<16x128xbf16>
      tpu.vector_store %arg6[%c0_15, %c0_16], %30 {strides = array<i32>} : memref<16x128xbf16, #tpu.memory_space<vmem>>, vector<16x128xbf16>,
    } else {
    }
    %c2_i32_13 = arith.constant 2 : i32
    %27 = arith.cmpi eq, %arg1, %c2_i32_13 : i32
    %28 = arith.extui %27 : i1 to i32
    %c0_i32_14 = arith.constant 0 : i32
    %29 = arith.cmpi ne, %28, %c0_i32_14 : i32
    scf.if %29 {
      %c0_15 = arith.constant 0 : index
      %c0_16 = arith.constant 0 : index
      %30 = vector.load %arg5[%c0_15, %c0_16] : memref<16x128xf32, #tpu.memory_space<vmem>>, vector<16x128xf32>
      tpu.vector_store %arg5[%c0_15, %c0_16], %23 {strides = array<i32>} : memref<16x128xf32, #tpu.memory_space<vmem>>, vector<16x128xf32>,
    } else {
    }
    return
  }
  func.func @transform_0(%arg0: i32, %arg1: i32) -> (i32, i32) {
    %c0_i32 = arith.constant 0 : i32
    %c0_i32_0 = arith.constant 0 : i32
    return %arg0, %c0_i32 : i32, i32
  }
  func.func @transform_1(%arg0: i32, %arg1: i32) -> (i32, i32, i32) {
    %c0_i32 = arith.constant 0 : i32
    %c0_i32_0 = arith.constant 0 : i32
    %c0_i32_1 = arith.constant 0 : i32
    return %arg1, %c0_i32, %c0_i32_0 : i32, i32, i32
  }
  func.func @transform_2(%arg0: i32, %arg1: i32) -> (i32, i32, i32) {
    %c0_i32 = arith.constant 0 : i32
    %c0_i32_0 = arith.constant 0 : i32
    %c0_i32_1 = arith.constant 0 : i32
    return %arg1, %c0_i32, %c0_i32_0 : i32, i32, i32
  }
  func.func @transform_3(%arg0: i32, %arg1: i32) -> (i32, i32) {
    %c0_i32 = arith.constant 0 : i32
    %c0_i32_0 = arith.constant 0 : i32
    return %arg0, %c0_i32 : i32, i32
  }
}

</mosaic_0001>

<bundles_post_ra>
// kernel: tpu_custom_call.1
= control target key start
LH: loop header
LB: loop body
LE: loop exit
PB: predicated region body
PF: predicated region fallthrough
CT: control target
= control target key end

     0   :  { %8 = vsyncpa [#allocation4], 0  ;;  %s982_s0 = inlined_call_operand.hbm [shape: bf16[16,128], index: 0, kind: input, shape index: {}]   ;;  %s983_s1 = inlined_call_operand.hbm [shape: bf16[3,128,128], index: 1, kind: input, shape index: {}]   ;;  %s984_s2 = inlined_call_operand.hbm [shape: f32[3,1,128], index: 2, kind: input, shape index: {}]   ;;  %s985_s3 = inlined_call_operand.hbm [shape: f32[16,128], index: 3, kind: output, shape index: {}]  }
   0x1   :  { %9 = vsyncpa [#allocation7], 0 }
   0x2   :  { %11 = vsyncpa [#allocation7 + $0x1], 0 }
   0x3   :  { %12 = vsyncpa [#allocation5], 0  ;;  %s849_s12 = smov 0   ;;  %s851_s13 = smov 0  }
   0x4   :  { %s853_s14 = smov 0   ;;  %s855_s15 = smov 0  }
   0x5   :  { %s857_s16 = smov 0   ;;  %s859_s17 = smov 0  }
   0x6 LB: > { %s27_s18 = sadd.s32 1, %s817_s16  ;;  %s63_s19 = sadd.s32 1, %s809_s14  ;;  %s821_s17 = sphi %s859_s17, %s18_s17   ;;  %s817_s16 = sphi %s857_s16, %s994_s16   ;;  %s813_s15 = sphi %s855_s15, %s993_s15   ;;  %s809_s14 = sphi %s853_s14, %s992_s14   ;;  %s805_s13 = sphi %s851_s13, %s991_s13   ;;  %s801_s12 = sphi %s849_s12, %s990_s12  }
   0x7   : > { %p28_p0 = scmp.ge.s32.totalorder %s27_s18, 3  ;;  %p70_p1 = scmp.ne.s32.totalorder %s809_s14, %s805_s13 }
   0x8   : > { %p71_p2 = scmp.eq.s32.totalorder %s821_s17, 0  ;;  %p582_p5 = scmp.lt.s32.totalorder %s821_s17, 3 }
   0x9   : > { %s996_s18 = smov (%p28_p0, %s27_s18), 0  ;;  %s169_s22 = sand.u32 1, %s821_s17  }
   0xa   : > { %p886_p3 = por %p71_p2, %p70_p1  ;;  %s60_s21 = ssub.s32 %s817_s16, %s996_s18 }
   0xb   : > { %p61_p4 = scmp.eq.s32.totalorder %s60_s21, 0  ;;  %s171_s23 = sand.u32 1, %s809_s14  }
   0xc   : > { %s494_s25 = sshll.u32 %s171_s23, 6  ;;  %s543_s26 = sshll.u32 %s817_s16, 6 }
   0xd   : > { %s896_s24 = scalar_select %p61_p4, %s809_s14, %s63_s19  }
   0xe   : > { %s178_s29 = scalar_lea.hbm %s983_s1, %s543_s26  ;;  %s173_s30 = scalar_lea.vmem [#allocation6], %s494_s25 }
   0xf   : > { %s181_s4 = sshll.u32 %s173_s30, 4  ;;  %s179_s5 = sshll.u32 %s178_s29, 4  ;;  %s182_s4 = int_to_ptr.vmem [resolvable:$true] %s181_s4  ;;  %s180_s5 = int_to_ptr.hbm [resolvable:$true] %s179_s5 }
  0x10   : > { %p906_p6 = pnand %p582_p5, %p886_p3  ;;  %s170_s7 = scalar_lea.sflag [#allocation7], %s169_s22 }
  0x11   : > { %s823_s8 = smov 64   ;;  %s824_s9 = smov 4  }
  0x12   : > { %577 = dma.hbm_to_vmem [thread:$0]  (!%p906_p6), %s180_s5, 1024, %s182_s4, %s170_s7, %s823_s8, %s823_s8, %s824_s9  }
  0x13   : > { %s913_s10 = sadd.s32 4294967295, %s821_s17   ;;  %p76_p7 = scmp.ne.s32.totalorder %s805_s13, %s801_s12 }
  0x14   : > { %p77_p8 = scmp.eq.s32.totalorder %s913_s10, 0  ;;  %p491_p9 = scmp.ge.s32.totalorder %s821_s17, 1 }
  0x15   : > { %p139_p10 = scmp.lt.s32.totalorder %s821_s17, 4  ;;  %s153_s22 = sshll.u32 %s982_s0, 4  ;;  %s154_s22 = int_to_ptr.hbm [resolvable:$true] %s153_s22 }
  0x16   : > { %p922_p11 = por %p77_p8, %p76_p7  ;;  %s825_s12 = smov [#allocation3]  }
  0x17   : > { %p926_p12 = pnand %p491_p9, %p139_p10  ;;  %s155_s25 = sshll.u32 %s825_s12, 4  ;;  %s156_s25 = int_to_ptr.vmem [resolvable:$true] %s155_s25 }
  0x18   : > { %s197_s28 = scalar_lea.hbm %s984_s2, %s817_s16  ;;  %s194_s30 = scalar_lea.vmem [#allocation8], %s171_s23 }
  0x19   : > { %p570_p13 = pneg %p926_p12  ;;  %s199_s29 = sshll.u32 %s197_s28, 4  ;;  %s200_s29 = int_to_ptr.hbm [resolvable:$true] %s199_s29 }
  0x1a   : > { %s201_s4 = sshll.u32 %s194_s30, 4  ;;  %210 = sbr.rel (%p926_p12) target bundleno = 254 (0xfe), region = 32  ;;  %s202_s4 = int_to_ptr.vmem [resolvable:$true] %s201_s4 }
  0x1b   : > { %p571_p0 = pnand %p570_p13, %p77_p8 }
  0x1c   : > { %580 = dma.hbm_to_vmem [thread:$0]  (!%p906_p6), %s200_s29, 16, %s202_s4, %s170_s7  }
  0x1d   : > { %573 = dma.hbm_to_vmem [thread:$0]  (!%p571_p0), %s154_s22, 128, %s156_s25, [#allocation4], %s823_s8, %s823_s8, %s824_s9  }
  0x1f   : > { %788 = dma.done.wait (%p77_p8), [#allocation4], 128  }
  0x20   : > { %790 = vsyncadd (%p77_p8), [#allocation4], 4294967168  ;;  %s217_s5 = sand.u32 1, %s913_s10   ;;  %s219_s23 = sand.u32 1, %s805_s13  }
  0x21   : > { %s499_s20 = sshll.u32 %s219_s23, 6  ;;  %s218_s21 = scalar_lea.sflag [#allocation7], %s217_s5 }
  0x22   : > { %s221_s8 = scalar_lea.vmem [#allocation6], %s499_s20 }
  0x23   : > { %792 = dma.done.wait (%p922_p11), %s218_s21, 1040  }
  0x24   : > { %794 = vsyncadd (%p922_p11), %s218_s21, 4294966256  ;;  %s230_s6 = scalar_lea.vmem [#allocation8], %s219_s23  ;;  %p500_p1 = scmp.ne.s32.totalorder %s813_s15, 0 }
  0x26   : > { %258 = sbr.rel (%p500_p1) target bundleno = 45 (0x2d), region = 48 }
  0x2b   : > { %v259_v0 = vld [vmem:[#allocation3] sm:$0xff]  }
  0x2c   : > { %261 = vst [vmem:[#allocation2] sm:$0xff] %v259_v0  }
  0x2d PF: > { %v552_v1 = vld [vmem:[%s221_s8 + $0x38] sm:$0xff]  ;;  %v551_v2 = vld [vmem:[%s221_s8 + $0x30] sm:$0xff]  ;;  %v550_v3 = vld [vmem:[%s221_s8 + $0x28] sm:$0xff]  ;;  %p537_p2 = scmp.eq.s32.totalorder %s813_s15, 2 }
  0x2e   : > { %339 = vmatpush.bf16.msra.mxu0 %v552_v1  ;;  %v549_v4 = vld [vmem:[%s221_s8 + $0x20] sm:$0xff]  ;;  %v548_v5 = vld [vmem:[%s221_s8 + $0x18] sm:$0xff]  ;;  %v547_v6 = vld [vmem:[%s221_s8 + $0x10] sm:$0xff] }
  0x2f   : > { %v546_v7 = vld [vmem:[%s221_s8 + $0x8] sm:$0xff]  ;;  %v545_v8 = vld [vmem:[%s221_s8] sm:$0xff]  ;;  %v640_v10 = vld [vmem:[%s230_s6] ss:$0 sm:$0xff] }
  0x32   : > { %340 = vmatpush.bf16.msra.mxu0 %v551_v2 }
  0x33   : > { %v544_v9 = vld [vmem:[#allocation2] sm:$0xff] }
  0x36   : > { %341 = vmatpush.bf16.msra.mxu0 %v550_v3 }
  0x3a   : > { %342 = vmatpush.bf16.msra.mxu0 %v549_v4 }
  0x3e   : > { %343 = vmatpush.bf16.msra.mxu0 %v548_v5 }
  0x42   : > { %344 = vmatpush.bf16.msra.mxu0 %v547_v6 }
  0x46   : > { %345 = vmatpush.bf16.msra.mxu0 %v546_v7 }
  0x4a   : > { %346 = vmatpush.bf16.msra.mxu0 %v545_v8 }
  0x4d   : > { %347 = vmatmul.bf16.vlgmr.msra.gmra.mxu0 %v544_v9 }
  0xca   : > { %v348_v11 = vpop.f32.mrf.mxu0 }
  0xcb   : > { %v349_v12 = vadd.f32 %v640_v10, %v348_v11 }
  0xcd   : > { %v353_v13 = vmul.f32 %v349_v12, %v349_v12 }
  0xcf   : > { %v355_v14 = vmul.f32 %v353_v13, %v349_v12 }
  0xd1   : > { %v357_v15 = vmul.f32 0.044715, %v355_v14 }
  0xd2   : > { %v350_v16 = vpop.f32.mrf.mxu0 }
  0xd3   : > { %v359_v17 = vadd.f32 %v357_v15, %v349_v12  ;;  %v351_v18 = vadd.f32 %v640_v10, %v350_v16 }
  0xd5   : > { %v361_v19 = vmul.f32 0.7978846, %v359_v17  ;;  %v354_v20 = vmul.f32 %v351_v18, %v351_v18 }
  0xd7   : > { %641 = vtanh.f32 %v361_v19  ;;  %v356_v21 = vmul.f32 %v354_v20, %v351_v18 }
  0xd9   : > { %v358_v22 = vmul.f32 0.044715, %v356_v21 }
  0xdb   : > { %v360_v23 = vadd.f32 %v358_v22, %v351_v18 }
  0xdd   : > { %v642_v24 = vpop.eup %641  ;;  %v362_v25 = vmul.f32 0.7978846, %v360_v23 }
  0xde   : > { %v365_v26 = vadd.f32 1.0, %v642_v24 }
  0xdf   : > { %643 = vtanh.f32 %v362_v25 }
  0xe0   : > { %v367_v27 = vmul.f32 0.5, %v365_v26 }
  0xe2   : > { %v369_v28 = vmul.f32 %v367_v27, %v349_v12 }
  0xe5   : > { %v644_v29 = vpop.eup %643 }
  0xe6   : > { %v366_v30 = vadd.f32 1.0, %v644_v29  ;;  %374 = sbr.rel (%p537_p2) target bundleno = 239 (0xef), region = 52 }
  0xe8   : > { %v368_v31 = vmul.f32 0.5, %v366_v30 }
  0xea   : > { %v370_v32 = vmul.f32 %v368_v31, %v351_v18 }
  0xec   : > { %v556_v33 = vpack.c.bf16 %v370_v32, %v369_v28 }
  0xee   : > { %557 = vst [vmem:[#allocation2] sm:$0xff] %v556_v33  }
  0xef PF: > { %p538_p3 = scmp.ne.s32.totalorder %s813_s15, 2 }
  0xf1   : > { %382 = sbr.rel (%p538_p3) target bundleno = 248 (0xf8), region = 56 }
  0xf6   : > { %383 = vst [vmem:[#allocation9] sm:$0xff] %v369_v28 }
  0xf7   : > { %384 = vst [vmem:[#allocation9 + $0x8] sm:$0xff] %v370_v32 }
  0xf8 PF: > { %p584_p4 = scmp.eq.s32.totalorder %s913_s10, 2  ;;  %s395_s11 = sshll.u32 %s985_s3, 4  ;;  %s396_s11 = int_to_ptr.hbm [resolvable:$true] %s395_s11 }
  0xf9   : > { %s826_s19 = smov [#allocation9]   ;;  %s827_s12 = smov 128  }
  0xfa   : > { %s393_s22 = sshll.u32 %s826_s19, 4  ;;  %s828_s25 = smov 8   ;;  %s394_s22 = int_to_ptr.vmem [resolvable:$true] %s393_s22 }
  0xfb   : > { %567 = dma.vmem_to_hbm [thread:$0]  (%p584_p4), %s394_s22, 256, %s396_s11, [#allocation5], %s827_s12, %s827_s12, %s828_s25  }
  0xfc   : > { %796 = dma.done.wait (%p584_p4), [#allocation5], 256  }
  0xfd   : > { %798 = vsyncadd (%p584_p4), [#allocation5], 4294967040 }
  0xfe PF: > { %s18_s17 = sadd.s32 1, %s821_s17   ;;  %s990_s12 = smov %s805_s13 }
  0xff   : > { %p15_p5 = scmp.ge.s32.totalorder %s18_s17, 5   ;;  %s991_s13 = smov %s809_s14 }
 0x100   : > { %s992_s14 = smov %s896_s24  ;;  %s993_s15 = smov %s817_s16 }
 0x101   : > { %s994_s16 = smov %s996_s18  ;;  %17 = sbr.rel (!%p15_p5) target bundleno = 6 (0x6), region = 99 }
 0x106   :  { %412 = vsyncpa [#allocation4], 1 }
 0x107   :  { %414 = vsyncpa [#allocation4 + $0x1], 1 }
 0x108   :  { %415 = vsyncpa [#allocation7], 1 }
 0x109   :  { %417 = vsyncpa [#allocation7 + $0x1], 1 }
 0x10a   :  { %418 = vsyncpa [#allocation5], 1 }
 0x10b   :  { %420 = vsyncpa [#allocation5 + $0x1], 1 }

</bundles_post_ra>
